<compile_context>
chip_gen: v5e
topology: v5e:2x2
jax: 0.10.0
libtpu: 0.0.40
codegen_flags: <defaults>
</compile_context>

<pallas_src>
import functools
import math

import jax
import jax.numpy as jnp
from jax.experimental import pallas as pl
from jax.experimental.pallas import tpu as pltpu


# ----------------------------------------------------------------------------
# Kernel body (shared by the whole-block and batch-gridded variants)
# ----------------------------------------------------------------------------

def _attention_kernel(inv_temp, q_ref, k_ref, v_ref, o_ref):
    # q_ref: (b, n, d)   k_ref: (b, m, d)   v_ref: (b, m, dv)   o_ref: (b, n, dv)
    q = q_ref[...]
    k = k_ref[...]

    if q.dtype == jnp.float32:
        # Fold 1/temperature into Q (exact for f32, touches b*n*d elements).
        q = q * inv_temp
        logits = jnp.einsum("bnd,bmd->bnm", q, k,
                            preferred_element_type=jnp.float32)
    else:
        # For low-precision inputs keep operands untouched for the MXU and
        # scale the f32 logits instead (no extra rounding of Q).
        logits = jnp.einsum("bnd,bmd->bnm", q, k,
                            preferred_element_type=jnp.float32)
        logits = logits * inv_temp

    # Numerically stable softmax over the key axis, kept in float32.
    logits = logits - jnp.max(logits, axis=-1, keepdims=True)
    e = jnp.exp(logits)
    denom = jnp.sum(e, axis=-1, keepdims=True)
    p = e * pl.reciprocal(denom, approx=True)          # EUP reciprocal

    out = jnp.einsum("bnm,bmd->bnd", p.astype(v_ref.dtype), v_ref[...],
                     preferred_element_type=jnp.float32)
    o_ref[...] = out.astype(o_ref.dtype)


# ----------------------------------------------------------------------------
# pallas_call builders (cached on static shape/dtype/temperature)
# ----------------------------------------------------------------------------

@functools.lru_cache(maxsize=None)
def _build_attention(b, n, m, d, dv, dtype_name, temperature, block_b):
    dtype = jnp.dtype(dtype_name)
    inv_temp = 1.0 / float(temperature)
    kern = functools.partial(_attention_kernel, inv_temp)
    out_shape = jax.ShapeDtypeStruct((b, n, dv), dtype)

    if block_b is None:
        # Whole-block: all operands resident in VMEM, a single kernel call.
        vmem = pltpu.MemorySpace.VMEM
        return pl.pallas_call(
            kern,
            in_specs=[pl.BlockSpec(memory_space=vmem),
                      pl.BlockSpec(memory_space=vmem),
                      pl.BlockSpec(memory_space=vmem)],
            out_specs=pl.BlockSpec(memory_space=vmem),
            out_shape=out_shape,
        )

    # Batch-gridded fallback for operands that do not fit VMEM at once.
    # Each grid step processes `block_b` full attention problems; the axis is
    # "parallel" so megacore chips (v7x) shard the batch across TensorCores.
    return pl.pallas_call(
        kern,
        grid=(b // block_b,),
        in_specs=[pl.BlockSpec((block_b, n, d), lambda i: (i, 0, 0)),
                  pl.BlockSpec((block_b, m, d), lambda i: (i, 0, 0)),
                  pl.BlockSpec((block_b, m, dv), lambda i: (i, 0, 0))],
        out_specs=pl.BlockSpec((block_b, n, dv), lambda i: (i, 0, 0)),
        out_shape=out_shape,
        compiler_params=pltpu.CompilerParams(
            dimension_semantics=("parallel",)),
    )


# ----------------------------------------------------------------------------
# Public wrapper
# ----------------------------------------------------------------------------

# Conservative across v5e/v6e/v7x scoped-VMEM defaults (16/32/32 MiB), leaving
# room for double-buffering and the f32 logits intermediate.
_VMEM_BUDGET_BYTES = 8 * 1024 * 1024


def attention(queries, keys, values, temperature):
    """queries (b,n,d), keys (b,m,d), values (b,m,dv) -> (b,n,dv)."""
    b, n, d = queries.shape
    bk, m, dk = keys.shape
    bv, mv, dv = values.shape
    assert b == bk == bv and d == dk and m == mv

    itemsize = jnp.dtype(queries.dtype).itemsize
    # operands + output (input dtype) + f32 logits + f32 output accumulator
    per_batch = (n * d + m * d + m * dv + n * dv) * itemsize \
        + n * m * 4 + n * dv * 4

    if b * per_batch <= _VMEM_BUDGET_BYTES:
        block_b = None
    else:
        # Largest divisor of b whose footprint fits the budget (>= 1).
        block_b = 1
        for cand in range(b, 0, -1):
            if b % cand == 0 and cand * per_batch <= _VMEM_BUDGET_BYTES:
                block_b = cand
                break
        # TODO(synk): very long n/m at block_b == 1 would additionally need
        # query/key tiling (flash-style online softmax); not required here.

    fn = _build_attention(b, n, m, d, dv, jnp.dtype(queries.dtype).name,
                          float(temperature), block_b)
    return fn(queries, keys, values)


# ----------------------------------------------------------------------------

if __name__ == "__main__":
    key = jax.random.PRNGKey(0)
    kq, kk, kv = jax.random.split(key, 3)

    # Small shapes consistent with the module; dv = 128 keeps the output store
    # lane-dense, d = 64 is a friendly MXU contraction dim.
    b, n, m, d, dv = 2, 16, 32, 64, 128
    temperature = math.sqrt(d)

    q = jax.random.normal(kq, (b, n, d), jnp.float32)
    k = jax.random.normal(kk, (b, m, d), jnp.float32)
    v = jax.random.normal(kv, (b, m, dv), jnp.float32)

    attn = jax.jit(functools.partial(attention, temperature=temperature))
    out = attn(q, k, v)
    jax.block_until_ready(out)

    # Pure-JAX reference (matches the PyTorch module semantics).
    ref_logits = jnp.einsum("bnd,bmd->bnm", q, k) / temperature
    ref = jnp.einsum("bnm,bmd->bnd", jax.nn.softmax(ref_logits, axis=-1), v)

    assert out.shape == (b, n, dv)
    max_err = float(jnp.max(jnp.abs(out - ref)))
    assert jnp.allclose(out, ref, atol=1e-2, rtol=1e-2), max_err

    print("KERNEL_OK")
</pallas_src>

<mosaic_0001>
module attributes {stable_mosaic.version = 11 : i64} {
  func.func @_attention_kernel(%arg0: memref<2x16x64xf32, #tpu.memory_space<vmem>>, %arg1: memref<2x32x64xf32, #tpu.memory_space<vmem>>, %arg2: memref<2x32x128xf32, #tpu.memory_space<vmem>>, %arg3: memref<2x16x128xf32, #tpu.memory_space<vmem>>) attributes {dimension_semantics = [], scalar_prefetch = 0 : i64, scratch_operands = 0 : i64, tpu.core_type = #tpu.core_type<tc>} {
    %c0 = arith.constant 0 : index
    %c0_0 = arith.constant 0 : index
    %c0_1 = arith.constant 0 : index
    %0 = vector.load %arg0[%c0, %c0_0, %c0_1] : memref<2x16x64xf32, #tpu.memory_space<vmem>>, vector<2x16x64xf32>
    %c0_2 = arith.constant 0 : index
    %c0_3 = arith.constant 0 : index
    %c0_4 = arith.constant 0 : index
    %1 = vector.load %arg1[%c0_2, %c0_3, %c0_4] : memref<2x32x64xf32, #tpu.memory_space<vmem>>, vector<2x32x64xf32>
    %cst = arith.constant 1.250000e-01 : f32
    %2 = vector.broadcast %cst : f32 to vector<2x16x64xf32>
    %3 = arith.mulf %0, %2 : vector<2x16x64xf32>
    "tpu.trace_start"() <{level = 10 : i32, message = "bnd,bmd->bnm"}> : () -> ()
    %cst_5 = arith.constant dense<0.000000e+00> : vector<2x16x32xf32>
    %4 = tpu.matmul %3, %1, %cst_5 {dimension_numbers = #tpu.dot_dimension_numbers<[2], [2], [1], [1], [0, 0, 0, 1, 1, 1], [0], [0]>} : vector<2x16x64xf32>, vector<2x32x64xf32>, vector<2x16x32xf32> -> vector<2x16x32xf32>
    "tpu.trace_stop"() : () -> ()
    %cst_6 = arith.constant dense<0xFF800000> : vector<2x16xf32>
    %5 = vector.multi_reduction <maximumf>, %4, %cst_6 [2] : vector<2x16x32xf32> to vector<2x16xf32>
    %6 = vector.shape_cast %5 : vector<2x16xf32> to vector<2x16x1xf32>
    %7 = vector.broadcast %6 : vector<2x16x1xf32> to vector<2x16x32xf32>
    %8 = arith.subf %4, %7 : vector<2x16x32xf32>
    %9 = math.exp %8 : vector<2x16x32xf32>
    %cst_7 = arith.constant dense<0.000000e+00> : vector<2x16xf32>
    %10 = vector.multi_reduction <add>, %9, %cst_7 [2] : vector<2x16x32xf32> to vector<2x16xf32>
    %11 = vector.shape_cast %10 : vector<2x16xf32> to vector<2x16x1xf32>
    %12 = tpu.reciprocal %11 {approx = true} : vector<2x16x1xf32> -> vector<2x16x1xf32>
    %13 = vector.broadcast %12 : vector<2x16x1xf32> to vector<2x16x32xf32>
    %14 = arith.mulf %9, %13 : vector<2x16x32xf32>
    %c0_8 = arith.constant 0 : index
    %c0_9 = arith.constant 0 : index
    %c0_10 = arith.constant 0 : index
    %15 = vector.load %arg2[%c0_8, %c0_9, %c0_10] : memref<2x32x128xf32, #tpu.memory_space<vmem>>, vector<2x32x128xf32>
    "tpu.trace_start"() <{level = 10 : i32, message = "bnm,bmd->bnd"}> : () -> ()
    %cst_11 = arith.constant dense<0.000000e+00> : vector<2x16x128xf32>
    %16 = tpu.matmul %14, %15, %cst_11 {dimension_numbers = #tpu.dot_dimension_numbers<[2], [1], [1], [2], [0, 0, 0, 1, 1, 2], [0], [0]>} : vector<2x16x32xf32>, vector<2x32x128xf32>, vector<2x16x128xf32> -> vector<2x16x128xf32>
    "tpu.trace_stop"() : () -> ()
    %c0_12 = arith.constant 0 : index
    %c0_13 = arith.constant 0 : index
    %c0_14 = arith.constant 0 : index
    %17 = vector.load %arg3[%c0_12, %c0_13, %c0_14] : memref<2x16x128xf32, #tpu.memory_space<vmem>>, vector<2x16x128xf32>
    tpu.vector_store %arg3[%c0_12, %c0_13, %c0_14], %16 {strides = array<i32>} : memref<2x16x128xf32, #tpu.memory_space<vmem>>, vector<2x16x128xf32>,
    return
  }
}

</mosaic_0001>

<bundles_post_ra>
// kernel: attention.1
= control target key start
LH: loop header
LB: loop body
LE: loop exit
PB: predicated region body
PF: predicated region fallthrough
CT: control target
= control target key end

     0   :  { %8 = vsyncpa [#allocation3], 0  ;;  %s510_s0 = inlined_call_operand.hbm [shape: f32[2,16,64], index: 0, kind: input, shape index: {}]   ;;  %s511_s1 = inlined_call_operand.hbm [shape: f32[2,32,64], index: 1, kind: input, shape index: {}]   ;;  %s512_s2 = inlined_call_operand.hbm [shape: f32[2,32,128], index: 2, kind: input, shape index: {}]   ;;  %s513_s3 = inlined_call_operand.hbm [shape: f32[2,16,128], index: 3, kind: output, shape index: {}]  }
   0x1   :  { %9 = vsyncpa [#allocation6], 0 }
   0x2   :  { %10 = vsyncpa [#allocation4], 0  ;;  %s28_s14 = sshll.u32 %s511_s1, 4  ;;  %s436_s15 = smov [#allocation5]   ;;  %s29_s14 = int_to_ptr.hbm [resolvable:$true] %s28_s14 }
   0x3   :  { %s30_s16 = sshll.u32 %s436_s15, 4  ;;  %s15_s19 = sshll.u32 %s510_s0, 4  ;;  %s31_s16 = int_to_ptr.vmem [resolvable:$true] %s30_s16  ;;  %s16_s19 = int_to_ptr.hbm [resolvable:$true] %s15_s19 }
   0x4   :  { %s437_s20 = smov 128   ;;  %s438_s21 = smov 8  }
   0x5   :  { %36 = dma.hbm_to_vmem [thread:$0]  %s29_s14, 1024, %s31_s16, [#allocation6], %s437_s20, %s437_s20, %s438_s21  }
   0x6   :  { %s439_s22 = smov [#allocation2]   ;;  %s41_s1 = sshll.u32 %s512_s2, 4  ;;  %s42_s1 = int_to_ptr.hbm [resolvable:$true] %s41_s1 }
   0x7   :  { %s17_s23 = sshll.u32 %s439_s22, 4  ;;  %s440_s0 = smov [#allocation7]   ;;  %s18_s23 = int_to_ptr.vmem [resolvable:$true] %s17_s23 }
   0x8   :  { %23 = dma.hbm_to_vmem [thread:$0]  %s16_s19, 512, %s18_s23, [#allocation3], %s437_s20, %s437_s20, %s438_s21  }
   0x9   :  { %s43_s26 = sshll.u32 %s440_s0, 4  ;;  %s44_s26 = int_to_ptr.vmem [resolvable:$true] %s43_s26 }
   0xa   :  { %49 = dma.hbm_to_vmem [thread:$0]  %s42_s1, 1024, %s44_s26, [#allocation6], %s437_s20, %s437_s20, %s438_s21  }
   0xb   :  { %430 = dma.done.wait [#allocation3], 512  }
   0xc   :  { %431 = vsyncadd [#allocation3], 4294966784 }
   0xd   :  { %432 = dma.done.wait [#allocation6], 2048  }
   0xe   :  { %433 = vsyncadd [#allocation6], 4294965248  ;;  %vm78_vm0 = vcmask 523264   ;;  %v69_v0 = vld [vmem:[#allocation5 + $0x18] sm:$0xff]  ;;  %v68_v2 = vld [vmem:[#allocation5 + $0x10] sm:$0xff]  ;;  %vm161_vm1 = vcmask 261120  }
   0xf   :  { %296 = vmatpush.xpose.msk.msra.mxu0 %vm78_vm0, %v69_v0  ;;  %v73_v1 = vld [vmem:[#allocation5 + $0x38] sm:$0xff]  ;;  %v72_v3 = vld [vmem:[#allocation5 + $0x30] sm:$0xff]  ;;  %v67_v4 = vld [vmem:[#allocation5 + $0x8] sm:$0xff]  ;;  %s441_s2 = smov [#allocation8]   ;;  %s282_s30 = sshll.u32 %s513_s3, 4  ;;  %s283_s30 = int_to_ptr.hbm [resolvable:$true] %s282_s30 }
  0x10   :  { %302 = vmatpush.xpose.msk.msra.mxu1 %vm78_vm0, %v73_v1  ;;  %v71_v5 = vld [vmem:[#allocation5 + $0x28] sm:$0xff]  ;;  %v62_v6 = vld [vmem:[#allocation2] sm:$0xff]  ;;  %v64_v8 = vld [vmem:[#allocation2 + $0x10] sm:$0xff]  ;;  %s280_s27 = sshll.u32 %s441_s2, 4  ;;  %s281_s27 = int_to_ptr.vmem [resolvable:$true] %s280_s27 }
  0x11   :  { %v66_v7 = vld [vmem:[#allocation5] sm:$0xff]  ;;  %v74_v10 = vmul.f32 0.125, %v62_v6  ;;  %v76_v11 = vmul.f32 0.125, %v64_v8  ;;  %v63_v12 = vld [vmem:[#allocation2 + $0x8] sm:$0xff]  ;;  %v65_v13 = vld [vmem:[#allocation2 + $0x18] sm:$0xff] }
  0x12   :  { %v70_v9 = vld [vmem:[#allocation5 + $0x20] sm:$0xff]  ;;  %v75_v14 = vmul.f32 0.125, %v63_v12  ;;  %v77_v15 = vmul.f32 0.125, %v65_v13  ;;  %v209_v44 = vld [vmem:[#allocation7 + $0x18] sm:$0xff]  ;;  %v208_v45 = vld [vmem:[#allocation7 + $0x10] sm:$0xff] }
  0x13   :  { %297 = vmatpush.xpose.msk.msra.mxu0 %vm78_vm0, %v68_v2  ;;  %232 = vmatpush.msra.mxu2 %v209_v44  ;;  %v207_v46 = vld [vmem:[#allocation7 + $0x8] sm:$0xff]  ;;  %v206_v47 = vld [vmem:[#allocation7] sm:$0xff]  ;;  %v213_v48 = vld [vmem:[#allocation7 + $0x38] sm:$0xff] }
  0x14   :  { %303 = vmatpush.xpose.msk.msra.mxu1 %vm78_vm0, %v72_v3  ;;  %v212_v49 = vld [vmem:[#allocation7 + $0x30] sm:$0xff]  ;;  %261 = vmatpush.msra.mxu3 %v213_v48  ;;  %v211_v50 = vld [vmem:[#allocation7 + $0x28] sm:$0xff]  ;;  %v210_v51 = vld [vmem:[#allocation7 + $0x20] sm:$0xff] }
  0x15   :  { %233 = vmatpush.msra.mxu2 %v208_v45 }
  0x16   :  { %262 = vmatpush.msra.mxu3 %v212_v49 }
  0x17   :  { %298 = vmatpush.xpose.msk.msra.mxu0 %vm78_vm0, %v67_v4  ;;  %234 = vmatpush.msra.mxu2 %v207_v46 }
  0x18   :  { %304 = vmatpush.xpose.msk.msra.mxu1 %vm78_vm0, %v71_v5  ;;  %263 = vmatpush.msra.mxu3 %v211_v50 }
  0x19   :  { %235 = vmatpush.msra.mxu2 %v206_v47 }
  0x1a   :  { %264 = vmatpush.msra.mxu3 %v210_v51 }
  0x1b   :  { %299 = vmatpush.xpose.msk.msra.mxu0 %vm78_vm0, %v66_v7 }
  0x1c   :  { %305 = vmatpush.xpose.msk.msra.mxu1 %vm78_vm0, %v70_v9 }
  0x1e   :  { %300 = vmatmul.msk.f32.vlgmr.msra.gmra.mxu0 %vm78_vm0, %v74_v10 }
  0x1f   :  { %306 = vmatmul.msk.f32.vlgmr.msra.gmra.mxu1 %vm78_vm0, %v76_v11 }
  0x26   :  { %301 = vmatmul.msk.f32.gmra.mxu0 %vm78_vm0, %v75_v14 }
  0x27   :  { %307 = vmatmul.msk.f32.gmra.mxu1 %vm78_vm0, %v77_v15 }
  0x9b   :  { %v114_v16 = vpop.f32.mrf.mxu0 }
  0x9c   :  { %v162_v17 = vsel %vm161_vm1, %v114_v16, -inf  ;;  %v155_v18 = vpop.f32.mrf.mxu1 }
  0x9d   :  { %163 = vmax.xlane.f32.xlu0 %v162_v17  ;;  %v168_v19 = vsel %vm161_vm1, %v155_v18, -inf }
  0xa3   :  { %v117_v20 = vpop.f32.mrf.mxu0 }
  0xa4   :  { %v165_v21 = vsel %vm161_vm1, %v117_v20, -inf  ;;  %v158_v22 = vpop.f32.mrf.mxu1 }
  0xa5   :  { %169 = vmax.xlane.f32.xlu0 %v168_v19  ;;  %166 = vmax.xlane.f32.xlu1 %v165_v21  ;;  %v171_v23 = vsel %vm161_vm1, %v158_v22, -inf }
  0xad   :  { %172 = vmax.xlane.f32.xlu1 %v171_v23 }
 0x110   :  { %v164_v24 = vpop.xlane.xlu0 %163 }
 0x111   :  { %v174_v25 = vsub.f32 %v114_v16, %v164_v24 }
 0x113   :  { %v178_v26 = vmul.f32 1.442695, %v174_v25 }
 0x115   :  { %318 = vpow2.f32 %v178_v26 }
 0x118   :  { %v170_v27 = vpop.xlane.xlu0 %169  ;;  %v167_v28 = vpop.xlane.xlu1 %166 }
 0x119   :  { %v176_v29 = vsub.f32 %v155_v18, %v170_v27  ;;  %v175_v30 = vsub.f32 %v117_v20, %v167_v28 }
 0x11b   :  { %v319_v31 = vpop.eup %318  ;;  %v182_v32 = vmul.f32 1.442695, %v176_v29  ;;  %v180_v33 = vmul.f32 1.442695, %v175_v30 }
 0x11c   :  { %v186_v34 = vsel %vm161_vm1, %v319_v31, 0.0 }
 0x11d   :  { %320 = vpow2.f32 %v182_v32  ;;  %187 = vadd.xlane.f32.xlu2 %v186_v34 }
 0x11e   :  { %322 = vpow2.f32 %v180_v33 }
 0x120   :  { %v173_v35 = vpop.xlane.xlu1 %172 }
 0x121   :  { %v177_v36 = vsub.f32 %v158_v22, %v173_v35 }
 0x123   :  { %v321_v37 = vpop.eup %320  ;;  %v184_v38 = vmul.f32 1.442695, %v177_v36 }
 0x124   :  { %v323_v39 = vpop.eup %322  ;;  %v192_v40 = vsel %vm161_vm1, %v321_v37, 0.0 }
 0x125   :  { %324 = vpow2.f32 %v184_v38  ;;  %193 = vadd.xlane.f32.xlu2 %v192_v40  ;;  %v189_v41 = vsel %vm161_vm1, %v323_v39, 0.0 }
 0x126   :  { %190 = vadd.xlane.f32.xlu0 %v189_v41 }
 0x12b   :  { %v325_v42 = vpop.eup %324 }
 0x12c   :  { %v195_v43 = vsel %vm161_vm1, %v325_v42, 0.0 }
 0x12d   :  { %196 = vadd.xlane.f32.xlu1 %v195_v43 }
 0x190   :  { %v188_v52 = vpop.xlane.xlu2 %187 }
 0x191   :  { %326 = vrcp.f32 %v188_v52 }
 0x197   :  { %v327_v53 = vpop.eup %326 }
 0x198   :  { %v194_v54 = vpop.xlane.xlu2 %193  ;;  %v202_v55 = vmul.f32 %v327_v53, %v319_v31 }
 0x199   :  { %328 = vrcp.f32 %v194_v54  ;;  %v191_v56 = vpop.xlane.xlu0 %190 }
 0x19a   :  { %330 = vrcp.f32 %v191_v56  ;;  %308 = vmatmul.msk.f32.vlgmr.msra.gmra.mxu2 %vm161_vm1, %v202_v55 }
 0x19f   :  { %v329_v57 = vpop.eup %328 }
 0x1a0   :  { %v331_v58 = vpop.eup %330  ;;  %v197_v59 = vpop.xlane.xlu1 %196  ;;  %v204_v60 = vmul.f32 %v329_v57, %v321_v37 }
 0x1a1   :  { %332 = vrcp.f32 %v197_v59  ;;  %v203_v61 = vmul.f32 %v331_v58, %v323_v39 }
 0x1a2   :  { %310 = vmatmul.msk.f32.vlgmr.msra.gmra.mxu3 %vm161_vm1, %v204_v60 }
 0x1a3   :  { %309 = vmatmul.msk.f32.gmra.mxu2 %vm161_vm1, %v203_v61 }
 0x1a7   :  { %v333_v62 = vpop.eup %332 }
 0x1a8   :  { %v205_v63 = vmul.f32 %v333_v62, %v325_v42 }
 0x1aa   :  { %311 = vmatmul.msk.f32.gmra.mxu3 %vm161_vm1, %v205_v63 }
 0x21d   :  { %v237_v0 = vpop.f32.mrf.mxu2 }
 0x21e   :  { %272 = vst [vmem:[#allocation8] sm:$0xff] %v237_v0 }
 0x225   :  { %v266_v1 = vpop.f32.mrf.mxu3 }
 0x226   :  { %v240_v2 = vpop.f32.mrf.mxu2  ;;  %274 = vst [vmem:[#allocation8 + $0x10] sm:$0xff] %v266_v1 }
 0x227   :  { %273 = vst [vmem:[#allocation8 + $0x8] sm:$0xff] %v240_v2 }
 0x22d   :  { %v269_v3 = vpop.f32.mrf.mxu3 }
 0x22e   :  { %275 = vst [vmem:[#allocation8 + $0x18] sm:$0xff] %v269_v3 }
 0x22f   :  { %288 = dma.vmem_to_hbm [thread:$0]  %s281_s27, 512, %s283_s30, [#allocation4], %s437_s20, %s437_s20, %s438_s21  }
 0x230   :  { %434 = dma.done.wait [#allocation4], 512  }
 0x231   :  { %435 = vsyncadd [#allocation4], 4294966784 }
 0x232   :  { %293 = vsyncpa [#allocation3], 1 }
 0x233   :  { %294 = vsyncpa [#allocation6], 1 }
 0x234   :  { %295 = vsyncpa [#allocation4], 1 }

</bundles_post_ra>
